<compile_context>
chip_gen: v5e
topology: v5e:2x2
jax: 0.10.0
libtpu: 0.0.40
codegen_flags: <defaults>
</compile_context>

<pallas_src>
import functools

import jax
import jax.numpy as jnp
import numpy as np
from jax import lax
from jax.experimental import pallas as pl
from jax.experimental.pallas import tpu as pltpu

EPS = 1e-6


# --------------------- channels_first=True (reduce sublanes) -----------------

def _ln_cf_kernel(x_ref, g_ref, b_ref, o_ref, *, eps):
    # x_ref: (C, TS)  channels on sublanes, spatial tile on lanes.
    # g_ref/b_ref: (C, 1).   o_ref: (C, TS).
    x = x_ref[...].astype(jnp.float32)
    mean = jnp.mean(x, axis=0, keepdims=True)                    # (1, TS)
    var = jnp.mean((x - mean) * (x - mean), axis=0, keepdims=True)
    xn = (x - mean) * lax.rsqrt(var + eps)
    g = g_ref[...].astype(jnp.float32)
    b = b_ref[...].astype(jnp.float32)
    o_ref[...] = (xn * g + b).astype(o_ref.dtype)


def _ln_channels_first(x3, gamma, beta, eps, tile_s):
    """x3: (B, C, S); LayerNorm over axis 1 (channels), per (b, s) position."""
    B, C, S = x3.shape
    ts = min(int(tile_s), S)
    if ts < S:                       # tiled path: lane tile must be 128-aligned
        ts = max(128, (ts // 128) * 128)
    grid = (B, pl.cdiv(S, ts))
    kernel = functools.partial(_ln_cf_kernel, eps=eps)
    return pl.pallas_call(
        kernel,
        out_shape=jax.ShapeDtypeStruct((B, C, S), x3.dtype),
        grid_spec=pltpu.PrefetchScalarGridSpec(
            num_scalar_prefetch=0,
            grid=grid,
            in_specs=[
                pl.BlockSpec((None, C, ts), lambda b, s: (b, 0, s)),
                pl.BlockSpec((None, C, 1), lambda b, s: (0, 0, 0)),
                pl.BlockSpec((None, C, 1), lambda b, s: (0, 0, 0)),
            ],
            out_specs=pl.BlockSpec((None, C, ts), lambda b, s: (b, 0, s)),
        ),
        compiler_params=pltpu.CompilerParams(
            dimension_semantics=("parallel", "parallel")),
    )(x3, gamma.reshape(1, C, 1), beta.reshape(1, C, 1))


# ------------------ channels_first=False (reduce lanes, no transpose) --------

def _ln_cl_kernel(x_ref, g_ref, b_ref, o_ref, *, eps):
    # x_ref: (TR, F)  rows on sublanes, features on lanes (reduce over lanes).
    # g_ref/b_ref: (1, F).   o_ref: (TR, F).
    x = x_ref[...].astype(jnp.float32)
    mean = jnp.mean(x, axis=-1, keepdims=True)                   # (TR, 1)
    var = jnp.mean((x - mean) * (x - mean), axis=-1, keepdims=True)
    xn = (x - mean) * lax.rsqrt(var + eps)
    g = g_ref[...].astype(jnp.float32)
    b = b_ref[...].astype(jnp.float32)
    o_ref[...] = (xn * g + b).astype(o_ref.dtype)


def _ln_channels_last(x2, gamma, beta, eps, tile_rows):
    """x2: (R, F); F.layer_norm over the trailing feature axis."""
    R, F = x2.shape
    tr = min(int(tile_rows), R)
    if tr < R:                        # tiled path: sublane tile must be 8-aligned
        tr = max(8, (tr // 8) * 8)
    grid = (pl.cdiv(R, tr),)
    kernel = functools.partial(_ln_cl_kernel, eps=eps)
    return pl.pallas_call(
        kernel,
        out_shape=jax.ShapeDtypeStruct((R, F), x2.dtype),
        grid_spec=pltpu.PrefetchScalarGridSpec(
            num_scalar_prefetch=0,
            grid=grid,
            in_specs=[
                pl.BlockSpec((tr, F), lambda r: (r, 0)),
                pl.BlockSpec((1, F), lambda r: (0, 0)),
                pl.BlockSpec((1, F), lambda r: (0, 0)),
            ],
            out_specs=pl.BlockSpec((tr, F), lambda r: (r, 0)),
        ),
        compiler_params=pltpu.CompilerParams(
            dimension_semantics=("parallel",)),
    )(x2, gamma.reshape(1, F), beta.reshape(1, F))


# --------------------------------- public API --------------------------------

def layernorm3d_forward(x, gamma, beta, *, eps=EPS, channels_first=False,
                        tile_s=2048, tile_rows=256):
    """Pallas implementation of LayerNorm3d.forward (both branches)."""
    if channels_first:
        B, C = x.shape[0], x.shape[1]
        S = int(np.prod(x.shape[2:])) if x.ndim > 2 else 1
        y = _ln_channels_first(x.reshape(B, C, S), gamma, beta, eps, tile_s)
        return y.reshape(x.shape)
    # channels_first=False: F.layer_norm over the trailing num_features axis.
    F = x.shape[-1]
    R = int(np.prod(x.shape[:-1])) if x.ndim > 1 else 1
    y = _ln_channels_last(x.reshape(R, F), gamma, beta, eps, tile_rows)
    return y.reshape(x.shape)


# --------------------------- pure-JAX references ------------------------------

def reference_layernorm3d(x, gamma, beta, channels_first, eps=EPS):
    x = x.astype(jnp.float32)
    gamma = gamma.astype(jnp.float32)
    beta = beta.astype(jnp.float32)
    if channels_first:
        u = x.mean(1, keepdims=True)
        s = ((x - u) ** 2).mean(1, keepdims=True)
        xn = (x - u) / jnp.sqrt(s + eps)
        gshape = (1, -1) + (1,) * (x.ndim - 2)
        return gamma.reshape(gshape) * xn + beta.reshape(gshape)
    u = x.mean(-1, keepdims=True)
    s = ((x - u) ** 2).mean(-1, keepdims=True)
    xn = (x - u) / jnp.sqrt(s + eps)
    return xn * gamma + beta


# ------------------------------------ main -----------------------------------

if __name__ == "__main__":
    key = jax.random.PRNGKey(0)
    k1, k2, k3, k4, k5, k6, k7 = jax.random.split(key, 7)

    # ---- 1) channels_first=True (NCDHW activation), tiled spatial axis -------
    N, C = 2, 4
    x_cf = jax.random.normal(k1, (N, C, 8, 8, 8), jnp.float32)      # S = 512
    g_cf = 1.0 + 0.1 * jax.random.normal(k2, (C,), jnp.float32)
    b_cf = 0.1 * jax.random.normal(k3, (C,), jnp.float32)
    out_cf = jax.block_until_ready(
        layernorm3d_forward(x_cf, g_cf, b_cf, channels_first=True, tile_s=256))
    ref_cf = reference_layernorm3d(x_cf, g_cf, b_cf, channels_first=True)
    np.testing.assert_allclose(np.asarray(out_cf), np.asarray(ref_cf),
                               rtol=2e-4, atol=2e-4)

    # ---- 2) channels_first=True, bf16 stream (f32 statistics inside) ---------
    x_bf = x_cf.astype(jnp.bfloat16)
    out_bf = jax.block_until_ready(
        layernorm3d_forward(x_bf, g_cf, b_cf, channels_first=True, tile_s=256))
    assert out_bf.dtype == jnp.bfloat16
    np.testing.assert_allclose(np.asarray(out_bf.astype(jnp.float32)),
                               np.asarray(ref_cf), rtol=5e-2, atol=5e-2)

    # ---- 3) channels_first=False (default F.layer_norm branch), row-tiled ----
    F = 16
    x_cl = jax.random.normal(k4, (2, 8, 8, F), jnp.float32)          # R = 128
    g_cl = 1.0 + 0.1 * jax.random.normal(k5, (F,), jnp.float32)
    b_cl = 0.1 * jax.random.normal(k6, (F,), jnp.float32)
    out_cl = jax.block_until_ready(
        layernorm3d_forward(x_cl, g_cl, b_cl, channels_first=False, tile_rows=32))
    ref_cl = reference_layernorm3d(x_cl, g_cl, b_cl, channels_first=False)
    np.testing.assert_allclose(np.asarray(out_cl), np.asarray(ref_cl),
                               rtol=2e-4, atol=2e-4)

    # ---- 4) channels_first=False, odd (non-128-aligned) feature count --------
    F2 = 10
    x_odd = jax.random.normal(k7, (2, 5, 7, F2), jnp.float32)        # R = 70
    g_odd = jnp.ones((F2,), jnp.float32)
    b_odd = jnp.zeros((F2,), jnp.float32)
    out_odd = jax.block_until_ready(
        layernorm3d_forward(x_odd, g_odd, b_odd, channels_first=False))
    ref_odd = reference_layernorm3d(x_odd, g_odd, b_odd, channels_first=False)
    np.testing.assert_allclose(np.asarray(out_odd), np.asarray(ref_odd),
                               rtol=2e-4, atol=2e-4)

    print("KERNEL_OK")
</pallas_src>

<mosaic_0001>
module attributes {stable_mosaic.version = 11 : i64} {
  func.func @_ln_cf_kernel(%arg0: i32, %arg1: i32, %arg2: memref<1x4x256xf32, #tpu.memory_space<vmem>>, %arg3: memref<1x4x1xf32, #tpu.memory_space<vmem>>, %arg4: memref<1x4x1xf32, #tpu.memory_space<vmem>>, %arg5: memref<1x4x256xf32, #tpu.memory_space<vmem>>) attributes {dimension_semantics = [#tpu.dimension_semantics<parallel>, #tpu.dimension_semantics<parallel>], iteration_bounds = array<i64: 2, 2>, scalar_prefetch = 0 : i64, scratch_operands = 0 : i64, tpu.core_type = #tpu.core_type<tc>, window_params = [{transform_indices = @transform_0, window_bounds = array<i64: 1, 4, 256>}, {pipeline_mode = #tpu.pipeline_mode<synchronous>, transform_indices = @transform_1, window_bounds = array<i64: 1, 4, 1>}, {pipeline_mode = #tpu.pipeline_mode<synchronous>, transform_indices = @transform_2, window_bounds = array<i64: 1, 4, 1>}, {transform_indices = @transform_3, window_bounds = array<i64: 1, 4, 256>}]} {
    %c0 = arith.constant 0 : index
    %c0_0 = arith.constant 0 : index
    %c0_1 = arith.constant 0 : index
    %0 = vector.load %arg2[%c0, %c0_0, %c0_1] : memref<1x4x256xf32, #tpu.memory_space<vmem>>, vector<1x4x256xf32>
    %1 = vector.shape_cast %0 : vector<1x4x256xf32> to vector<4x256xf32>
    %cst = arith.constant dense<0.000000e+00> : vector<256xf32>
    %2 = vector.multi_reduction <add>, %1, %cst [0] : vector<4x256xf32> to vector<256xf32>
    %3 = vector.shape_cast %2 : vector<256xf32> to vector<1x256xf32>
    %cst_2 = arith.constant 4.000000e+00 : f32
    %4 = vector.broadcast %cst_2 : f32 to vector<1x256xf32>
    %5 = arith.divf %3, %4 : vector<1x256xf32>
    %6 = vector.broadcast %5 : vector<1x256xf32> to vector<4x256xf32>
    %7 = arith.subf %1, %6 : vector<4x256xf32>
    %8 = vector.broadcast %5 : vector<1x256xf32> to vector<4x256xf32>
    %9 = arith.subf %1, %8 : vector<4x256xf32>
    %10 = arith.mulf %7, %9 : vector<4x256xf32>
    %cst_3 = arith.constant dense<0.000000e+00> : vector<256xf32>
    %11 = vector.multi_reduction <add>, %10, %cst_3 [0] : vector<4x256xf32> to vector<256xf32>
    %12 = vector.shape_cast %11 : vector<256xf32> to vector<1x256xf32>
    %cst_4 = arith.constant 4.000000e+00 : f32
    %13 = vector.broadcast %cst_4 : f32 to vector<1x256xf32>
    %14 = arith.divf %12, %13 : vector<1x256xf32>
    %15 = vector.broadcast %5 : vector<1x256xf32> to vector<4x256xf32>
    %16 = arith.subf %1, %15 : vector<4x256xf32>
    %cst_5 = arith.constant 9.99999997E-7 : f32
    %17 = vector.broadcast %cst_5 : f32 to vector<1x256xf32>
    %18 = arith.addf %14, %17 : vector<1x256xf32>
    %19 = math.rsqrt %18 : vector<1x256xf32>
    %20 = vector.broadcast %19 : vector<1x256xf32> to vector<4x256xf32>
    %21 = arith.mulf %16, %20 : vector<4x256xf32>
    %c0_6 = arith.constant 0 : index
    %c0_7 = arith.constant 0 : index
    %c0_8 = arith.constant 0 : index
    %22 = vector.load %arg3[%c0_6, %c0_7, %c0_8] : memref<1x4x1xf32, #tpu.memory_space<vmem>>, vector<1x4x1xf32>
    %23 = vector.shape_cast %22 : vector<1x4x1xf32> to vector<4x1xf32>
    %c0_9 = arith.constant 0 : index
    %c0_10 = arith.constant 0 : index
    %c0_11 = arith.constant 0 : index
    %24 = vector.load %arg4[%c0_9, %c0_10, %c0_11] : memref<1x4x1xf32, #tpu.memory_space<vmem>>, vector<1x4x1xf32>
    %25 = vector.shape_cast %24 : vector<1x4x1xf32> to vector<4x1xf32>
    %26 = vector.broadcast %23 : vector<4x1xf32> to vector<4x256xf32>
    %27 = arith.mulf %21, %26 : vector<4x256xf32>
    %28 = vector.broadcast %25 : vector<4x1xf32> to vector<4x256xf32>
    %29 = arith.addf %27, %28 : vector<4x256xf32>
    %c0_12 = arith.constant 0 : index
    %c0_13 = arith.constant 0 : index
    %c0_14 = arith.constant 0 : index
    %30 = vector.load %arg5[%c0_12, %c0_13, %c0_14] : memref<1x4x256xf32, #tpu.memory_space<vmem>>, vector<1x4x256xf32>
    %31 = vector.shape_cast %30 : vector<1x4x256xf32> to vector<4x256xf32>
    %32 = vector.shape_cast %29 : vector<4x256xf32> to vector<1x4x256xf32>
    tpu.vector_store %arg5[%c0_12, %c0_13, %c0_14], %32 {strides = array<i32>} : memref<1x4x256xf32, #tpu.memory_space<vmem>>, vector<1x4x256xf32>,
    return
  }
  func.func @transform_0(%arg0: i32, %arg1: i32) -> (i32, i32, i32) {
    %c0_i32 = arith.constant 0 : i32
    %c0_i32_0 = arith.constant 0 : i32
    return %arg0, %c0_i32, %arg1 : i32, i32, i32
  }
  func.func @transform_1(%arg0: i32, %arg1: i32) -> (i32, i32, i32) {
    %c0_i32 = arith.constant 0 : i32
    %c0_i32_0 = arith.constant 0 : i32
    %c0_i32_1 = arith.constant 0 : i32
    %c0_i32_2 = arith.constant 0 : i32
    return %c0_i32, %c0_i32_0, %c0_i32_1 : i32, i32, i32
  }
  func.func @transform_2(%arg0: i32, %arg1: i32) -> (i32, i32, i32) {
    %c0_i32 = arith.constant 0 : i32
    %c0_i32_0 = arith.constant 0 : i32
    %c0_i32_1 = arith.constant 0 : i32
    %c0_i32_2 = arith.constant 0 : i32
    return %c0_i32, %c0_i32_0, %c0_i32_1 : i32, i32, i32
  }
  func.func @transform_3(%arg0: i32, %arg1: i32) -> (i32, i32, i32) {
    %c0_i32 = arith.constant 0 : i32
    %c0_i32_0 = arith.constant 0 : i32
    return %arg0, %c0_i32, %arg1 : i32, i32, i32
  }
}

</mosaic_0001>

<bundles_post_ra>
// kernel: tpu_custom_call.1
= control target key start
LH: loop header
LB: loop body
LE: loop exit
PB: predicated region body
PF: predicated region fallthrough
CT: control target
= control target key end

     0   :  { %8 = vsyncpa [#allocation3], 0  ;;  %s842_s0 = inlined_call_operand.hbm [shape: f32[2,4,512], index: 0, kind: input, shape index: {}]   ;;  %s843_s1 = inlined_call_operand.vmem [shape: f32[1,4,1], index: 1, kind: input, shape index: {}]   ;;  %s844_s2 = inlined_call_operand.vmem [shape: f32[1,4,1], index: 2, kind: input, shape index: {}]   ;;  %s845_s3 = inlined_call_operand.hbm [shape: f32[2,4,512], index: 3, kind: output, shape index: {}]  }
   0x1   :  { %10 = vsyncpa [#allocation3 + $0x1], 0 }
   0x2   :  { %11 = vsyncpa [#allocation4], 0 }
   0x3   :  { %13 = vsyncpa [#allocation4 + $0x1], 0  ;;  %s684_s12 = smov 0   ;;  %s686_s13 = smov 0  }
   0x4   :  { %s688_s14 = smov 0   ;;  %s690_s15 = smov 0  }
   0x5   :  { %s692_s16 = smov 0   ;;  %s694_s17 = smov 0  }
   0x6   :  { %s696_s18 = smov 0   ;;  %s698_s19 = smov 0  }
   0x7 LB: > { %s426_s20 = sadd.s32 4294967295, %s659_s19   ;;  %s427_s21 = sadd.s32 4294967294, %s659_s19   ;;  %s659_s19 = sphi %s698_s19, %s19_s19   ;;  %s655_s18 = sphi %s696_s18, %s859_s18   ;;  %s651_s17 = sphi %s694_s17, %s858_s17   ;;  %s647_s16 = sphi %s692_s16, %s857_s16   ;;  %s643_s15 = sphi %s690_s15, %s856_s15   ;;  %s639_s14 = sphi %s688_s14, %s855_s14   ;;  %s635_s13 = sphi %s686_s13, %s854_s13   ;;  %s631_s12 = sphi %s684_s12, %s853_s12  }
   0x8   : > { %s28_s22 = sadd.s32 1, %s651_s17  ;;  %s31_s23 = sadd.s32 1, %s655_s18 }
   0x9   : > { %p29_p0 = scmp.ge.s32.totalorder %s28_s22, 2  ;;  %s40_s24 = sadd.s32 1, %s639_s14 }
   0xa   : > { %p47_p1 = scmp.ne.s32.totalorder %s639_s14, %s635_s13  ;;  %p48_p2 = scmp.eq.s32.totalorder %s659_s19, 0 }
   0xb   : > { %s861_s22 = smov (%p29_p0, %s28_s22), 0  ;;  %s863_s23 = smov (!%p29_p0, %s31_s23), %s655_s18 }
   0xc   : > { %s36_s25 = ssub.s32 %s651_s17, %s861_s22  ;;  %p737_p3 = por %p48_p2, %p47_p1 }
   0xd   : > { %p33_p4 = scmp.ge.s32.totalorder %s863_s23, 2  ;;  %p53_p5 = scmp.ne.s32.totalorder %s635_s13, %s631_s12 }
   0xe   : > { %p54_p6 = scmp.eq.s32.totalorder %s426_s20, 0  ;;  %p121_p7 = scmp.eq.s32.totalorder %s426_s20, 3 }
   0xf   : > { %s865_s23 = smov (%p33_p4, %s863_s23), 0  ;;  %p127_p10 = scmp.eq.s32.totalorder %s427_s21, 3 }
  0x10   : > { %848 = sst [smem:[#allocation8_spill]] %s865_s23  ;;  %p745_p8 = por %p54_p6, %p53_p5 }
  0x11   : > { %p749_p9 = por %p121_p7, %p47_p1  ;;  %s35_s29 = ssub.s32 %s655_s18, %s865_s23 }
  0x12   : > { %s37_s30 = sor.u32 %s36_s25, %s35_s29  ;;  %p755_p12 = por %p127_p10, %p53_p5 }
  0x13   : > { %p38_p11 = scmp.eq.s32.totalorder %s37_s30, 0  ;;  %p455_p13 = scmp.lt.s32.totalorder %s659_s19, 4 }
  0x14   : > { %s153_s5 = sand.u32 1, %s639_s14   ;;  %s431_s8 = sshll.u32 %s651_s17, 1 }
  0x15   : > { %s762_s6 = scalar_select %p38_p11, %s639_s14, %s40_s24  }
  0x16   : > { %s430_s7 = sshll.u32 %s153_s5, 3  ;;  %s432_s9 = sshll.u32 %s655_s18, 2 }
  0x17   : > { %s157_s10 = scalar_lea.vmem [#allocation2], %s430_s7  ;;  %s162_s20 = sadd.s32 %s432_s9, %s431_s8 }
  0x18   : > { %s168_s11 = sshll.u32 %s157_s10, 4  ;;  %s433_s21 = sshll.u32 %s162_s20, 2  ;;  %s169_s11 = int_to_ptr.vmem [resolvable:$true] %s168_s11 }
  0x19   : > { %p448_p0 = pnand %p455_p13, %p737_p3  ;;  %s164_s30 = scalar_lea.hbm %s842_s0, %s433_s21 }
  0x1a   : > { %p434_p1 = scmp.ge.s32.totalorder %s659_s19, 1  ;;  %s166_s23 = sshll.u32 %s164_s30, 4  ;;  %s167_s23 = int_to_ptr.hbm [resolvable:$true] %s166_s23 }
  0x1b   : > { %p173_p2 = scmp.lt.s32.totalorder %s659_s19, 5  ;;  %s154_s24 = scalar_lea.sflag [#allocation3], %s153_s5 }
  0x1c   : > { %450 = dma.hbm_to_vmem [thread:$0]  (!%p448_p0), %s167_s23, 128, %s169_s11, %s154_s24  }
  0x1d   : > { %p174_p4 = pnand %p434_p1, %p173_p2 }
  0x1e   : > { %s774_s7 = sand.u32 (!%p174_p4), 1, %s635_s13  }
  0x1f   : > { %177 = sbr.rel (%p174_p4) target bundleno = 169 (0xa9), region = 32  ;;  %s435_s26 = sshll.u32 (!%p174_p4), %s774_s7, 3 }
  0x20   : > { %s180_s8 = scalar_lea.sflag (!%p174_p4), [#allocation3], %s774_s7  ;;  %s183_s9 = scalar_lea.vmem (!%p174_p4), [#allocation2], %s435_s26 }
  0x24   : > { %622 = dma.done.wait (%p745_p8), %s180_s8, 128  }
  0x25   : > { %624 = vsyncadd (%p745_p8), %s180_s8, 4294967168  ;;  %v661_v0 = vmov 0   ;;  %v297_v1 = vld [vmem:[%s843_s1] sm:$0xf]  ;;  %v662_v2 = vmov 4.0   ;;  %v209_v5 = vld [vmem:[%s183_s9] sm:$0xff] }
  0x26   : > { %524 = vset.pattern.permute.xlu0 %v661_v0  ;;  %525 = vrcp.f32 %v662_v2  ;;  %v298_v3 = vld [vmem:[%s844_s2] sm:$0xf]  ;;  %211 = vst [vmem:[#allocation1] ss:$2 sm:$0xff] %v209_v5  ;;  %vm216_vm0 = vcmask 1043456   ;;  %s438_s27 = sshll.u32 %s643_s15, 1 }
  0x27   : > { %301 = vperm.xlu0 %524, %v297_v1   ;;  %s439_s20 = sshll.u32 %s647_s16, 2  ;;  %s206_s8 = scalar_lea.vmem [#allocation5], %s435_s26 }
  0x28   : > { %s332_s21 = sadd.s32 %s439_s20, %s438_s27  ;;  %s336_s9 = sshll.u32 %s206_s8, 4  ;;  %s337_s9 = int_to_ptr.vmem [resolvable:$true] %s336_s9 }
  0x29   : > { %s440_s25 = sshll.u32 %s332_s21, 2  ;;  %s321_s15 = scalar_lea.sflag [#allocation4], %s774_s7 }
  0x2a   : > { %s334_s24 = scalar_lea.hbm %s845_s3, %s440_s25  ;;  %s581_s26 = scalar_lea.hbm %s845_s3, 32 }
  0x2b   : > { %s338_s23 = sshll.u32 %s334_s24, 4  ;;  %s339_s23 = int_to_ptr.hbm [resolvable:$true] %s338_s23 }
  0x2c   : > { %v526_v4 = vpop.eup %525  ;;  %s575_s16 = sshra.s32 %s339_s23, 4  ;;  %s576_s16 = int_to_ptr.hbm [resolvable:$true] %s575_s16 }
  0x2d   : > { %v232_v6 = vmul.f32 4.0, %v526_v4  ;;  %v213_v8 = vld.sshfl [vmem:[#allocation1 + $0x8] sm:$0xff pattern:$0x75316420]  ;;  %vm236_vm1 = vweird.f32 %v526_v4  ;;  %s577_s5 = scalar_lea.hbm %s576_s16, 8  ;;  %p582_p7 = scmp.lt.s32.totalorder %s576_s16, %s845_s3 }
  0x2e   : > { %v224_v9 = vsel %vm216_vm0, %v213_v8, 0.0  ;;  %v212_v10 = vld.sshfl [vmem:[#allocation1] sm:$0xff pattern:$0x75316420]  ;;  %p578_p3 = scmp.ne.s32.totalorder %s576_s16, %s577_s5  ;;  %p583_p8 = scmp.lt.s32.totalorder %s581_s26, %s577_s5 }
  0x2f   : > { %311 = vperm.xlu0 %524, %v298_v3   ;;  %v233_v7 = vsub.f32 1.0, %v232_v6  ;;  %v225_v11 = vrot.slane %v224_v9, 4  ;;  %v217_v13 = vsel %vm216_vm0, %v212_v10, 0.0  ;;  %v663_v6 = vmov 839922192  }
  0x30   : > { %v218_v14 = vrot.slane %v217_v13, 4  ;;  %p579_p5 = pnand %p578_p3, %p749_p9  ;;  %p584_p10 = por %p583_p8, %p582_p7 }
  0x31   : > { %v234_v12 = vmul.f32 %v526_v4, %v233_v7  ;;  %v226_v15 = vadd.f32 %v225_v11, %v224_v9  ;;  %v304_v7 = vunpack.c.l.s4 %v663_v6 }
  0x32   : > { %v219_v16 = vadd.f32 %v218_v14, %v217_v13  ;;  %p580_p6 = pneg %p579_p5 }
  0x33   : > { %v227_v17 = vrot.slane %v226_v15, 2  ;;  %v235_v18 = vadd.f32 %v526_v4, %v234_v12  ;;  %v305_v9 = vunpack.c.0.s8 %v304_v7 }
  0x34   : > { %v220_v19 = vrot.slane %v219_v16, 2  ;;  %p585_p11 = pnand %p584_p10, %p580_p6 }
  0x35   : > { %v228_v20 = vadd.f32 %v227_v17, %v226_v15  ;;  %v237_v23 = vsel %vm236_vm1, %v526_v4, %v235_v18 }
  0x36   : > { %v221_v21 = vadd.f32 %v220_v19, %v219_v16 }
  0x37   : > { %v229_v22 = vrot.slane %v228_v20, 1 }
  0x38   : > { %v222_v24 = vrot.slane %v221_v21, 1 }
  0x39   : > { %v230_v25 = vadd.f32 %v229_v22, %v228_v20 }
  0x3a   : > { %v223_v26 = vadd.f32 %v222_v24, %v221_v21 }
  0x3b   : > { %v239_v27 = vmul.f32 %v237_v23, %v230_v25 }
  0x3c   : > { %v238_v28 = vmul.f32 %v237_v23, %v223_v26 }
  0x3d   : > { %v242_v29 = vrot.slane %v239_v27, 4 }
  0x3f   : > { %v243_v30 = vsel %vm216_vm0, %v238_v28, %v242_v29 }
  0x40   : > { %v245_v31 = vsub.f32 %v209_v5, %v243_v30 }
  0x42   : > { %v246_v32 = vmul.f32 %v245_v31, %v245_v31 }
  0x44   : > { %248 = vst [vmem:[#allocation1] ss:$2 sm:$0xff] %v246_v32 }
  0x4b   : > { %v250_v33 = vld.sshfl [vmem:[#allocation1 + $0x8] sm:$0xff pattern:$0x75316420]  ;;  %v249_v35 = vld.sshfl [vmem:[#allocation1] sm:$0xff pattern:$0x75316420] }
  0x4c   : > { %v260_v34 = vsel %vm216_vm0, %v250_v33, 0.0  ;;  %v253_v37 = vsel %vm216_vm0, %v249_v35, 0.0 }
  0x4d   : > { %v261_v36 = vrot.slane %v260_v34, 4  ;;  %v254_v38 = vrot.slane %v253_v37, 4 }
  0x4f   : > { %v262_v39 = vadd.f32 %v261_v36, %v260_v34  ;;  %v255_v40 = vadd.f32 %v254_v38, %v253_v37 }
  0x51   : > { %v263_v41 = vrot.slane %v262_v39, 2  ;;  %v256_v42 = vrot.slane %v255_v40, 2 }
  0x53   : > { %v264_v43 = vadd.f32 %v263_v41, %v262_v39  ;;  %v257_v44 = vadd.f32 %v256_v42, %v255_v40 }
  0x55   : > { %v265_v45 = vrot.slane %v264_v43, 1  ;;  %v258_v46 = vrot.slane %v257_v44, 1 }
  0x57   : > { %v266_v47 = vadd.f32 %v265_v45, %v264_v43  ;;  %v259_v48 = vadd.f32 %v258_v46, %v257_v44 }
  0x59   : > { %v268_v49 = vmul.f32 %v266_v47, %v237_v23  ;;  %v267_v50 = vmul.f32 %v259_v48, %v237_v23 }
  0x5b   : > { %v270_v51 = vadd.f32 1e-06, %v268_v49  ;;  %v269_v52 = vadd.f32 1e-06, %v267_v50 }
  0x5d   : > { %527 = vrsqrt.f32 %v270_v51  ;;  %vm287_vm2 = vweird.f32 %v270_v51  ;;  %vm277_vm5 = vweird.f32 %v269_v52 }
  0x5e   : > { %529 = vrsqrt.f32 %v269_v52 }
  0x63   : > { %v528_v53 = vpop.eup %527 }
  0x64   : > { %v282_v54 = vmul.f32 %v528_v53, %v270_v51  ;;  %v530_v55 = vpop.eup %529  ;;  %vm288_vm3 = vweird.f32 %v528_v53 }
  0x65   : > { %v272_v56 = vmul.f32 %v530_v55, %v269_v52  ;;  %vm289_vm4 = vmor %vm287_vm2, %vm288_vm3  ;;  %vm278_vm6 = vweird.f32 %v530_v55 }
  0x66   : > { %v283_v57 = vmul.f32 %v528_v53, %v282_v54  ;;  %vm279_vm7 = vmor %vm277_vm5, %vm278_vm6 }
  0x67   : > { %v273_v58 = vmul.f32 %v530_v55, %v272_v56 }
  0x68   : > { %v284_v59 = vmul.f32 0.5, %v283_v57 }
  0x69   : > { %v274_v60 = vmul.f32 0.5, %v273_v58 }
  0x6a   : > { %v285_v61 = vsub.f32 1.5, %v284_v59 }
  0x6b   : > { %v275_v62 = vsub.f32 1.5, %v274_v60 }
  0x6c   : > { %v286_v63 = vmul.f32 %v528_v53, %v285_v61 }
  0x6d   : > { %v276_v0 = vmul.f32 %v530_v55, %v275_v62 }
  0x6e   : > { %v290_v1 = vsel %vm289_vm4, %v528_v53, %v286_v63 }
  0x6f   : > { %v293_v2 = vrot.slane %v290_v1, 4  ;;  %v280_v3 = vsel %vm279_vm7, %v530_v55, %v276_v0 }
  0x71   : > { %v294_v4 = vsel %vm216_vm0, %v280_v3, %v293_v2 }
  0x72   : > { %v296_v5 = vmul.f32 %v294_v4, %v245_v31 }
  0x99   : > { %v302_v8 = vpop.permute.xlu0 %301 }
  0x9a   : > { %v306_v10 = vperm.slane %v302_v8, %v305_v9 }
  0x9c   : > { %v308_v12 = vmul.f32 %v306_v10, %v296_v5 }
  0xa1   : > { %v312_v11 = vpop.permute.xlu0 %311 }
  0xa2   : > { %v316_v13 = vperm.slane %v312_v11, %v305_v9 }
  0xa4   : > { %v318_v14 = vadd.f32 %v316_v13, %v308_v12 }
  0xa6   : > { %319 = vst [vmem:[%s206_s8] sm:$0xff] %v318_v14 }
  0xa7   : > { %588 = shalt.err (!%p585_p11)
}
  0xa8   : > { %445 = dma.vmem_to_hbm [thread:$0]  (%p749_p9), %s337_s9, 128, %s339_s23, %s321_s15  }
  0xa9 PF: > { %p456_p13 = scmp.ge.s32.totalorder %s659_s19, 2  ;;  %s350_s7 = sand.u32 1, %s631_s12  }
  0xaa   : > { %s351_s21 = scalar_lea.sflag [#allocation4], %s350_s7 }
  0xab   : > { %p452_p0 = pnand %p456_p13, %p755_p12 }
  0xad   : > { %p453_p1 = pneg %p452_p0 }
  0xaf   : > { %626 = dma.done.wait (%p453_p1), %s351_s21, 128  }
  0xb0   : > { %628 = vsyncadd (%p453_p1), %s351_s21, 4294967168  ;;  %s19_s19 = sadd.s32 1, %s659_s19   ;;  %s852_s28 = sld [smem:[#allocation8_spill]] }
  0xb1   : > { %p16_p2 = scmp.ge.s32.totalorder %s19_s19, 6   ;;  %s853_s12 = smov %s635_s13 }
  0xb2   : > { %s854_s13 = smov %s639_s14  ;;  %s855_s14 = smov %s762_s6 }
  0xb3   : > { %s856_s15 = smov %s651_s17  ;;  %s857_s16 = smov %s655_s18 }
  0xb4   : > { %s858_s17 = smov %s861_s22  ;;  %18 = sbr.rel (!%p16_p2) target bundleno = 7 (0x7), region = 77 }
  0xb6   : > { %s859_s18 = smov %s852_s28 }
  0xb9   :  { %357 = vsyncpa [#allocation3], 1 }
  0xba   :  { %359 = vsyncpa [#allocation3 + $0x1], 1 }
  0xbb   :  { %360 = vsyncpa [#allocation4], 1 }
  0xbc   :  { %362 = vsyncpa [#allocation4 + $0x1], 1 }

</bundles_post_ra>
